<compile_context>
chip_gen: v5e
topology: v5e:2x2
jax: 0.10.0
libtpu: 0.0.40
codegen_flags: <defaults>
</compile_context>

<pallas_src>
import jax
import jax.numpy as jnp
from jax.experimental import pallas as pl
from jax.experimental.pallas import tpu as pltpu


def _outconv_kernel(x_ref, w_ref, b_ref, o_ref):
    """Pointwise channel mix on one sublane-dense spatial tile.

    x_ref : (C_in,  s_blk, 128) VMEM  -- dense (sublane, lane) per channel
    w_ref : (C_out, C_in)       SMEM  -- scalar weights (f32)
    b_ref : (C_out,)            SMEM  -- scalar bias (f32)
    o_ref : (C_out, s_blk, 128) VMEM
    """
    c_in = x_ref.shape[0]
    c_out = o_ref.shape[0]

    # Native bf16 compute on chips with bf16 VALU; otherwise f32 (exact for
    # f32 inputs, where the casts below are no-ops).
    cdt = jnp.bfloat16 if x_ref.dtype == jnp.bfloat16 else jnp.float32

    # Tiny C_in/C_out: pure VPU scalar*vector FMAs, no MXU.  Re-read the
    # (s_blk, 128) channel slab from VMEM per output channel (vld has slack)
    # instead of keeping all C_in slabs live across the loop.
    for co in range(c_out):
        acc = x_ref[0].astype(cdt) * w_ref[co, 0].astype(cdt)
        for ci in range(1, c_in):
            acc = acc + x_ref[ci].astype(cdt) * w_ref[co, ci].astype(cdt)
        o_ref[co] = (acc + b_ref[co].astype(cdt)).astype(o_ref.dtype)


def outconv_pallas(x_ncdhw, weight, bias, *, tile_m=65536):
    """1x1x1 Conv3d (OutConv.forward).

    x_ncdhw : (N, C_in, D, H, W)      -- PyTorch NCDHW convention
    weight  : (C_out, C_in, 1, 1, 1)
    bias    : (C_out,)
    returns : (N, C_out, D, H, W)
    """
    N, C_in, D, H, W = x_ncdhw.shape
    C_out = weight.shape[0]
    dhw = D * H * W

    # --- layout: channels on an outer axis, spatial as dense (S, 128) ------
    dhw_pad = pl.cdiv(dhw, 128) * 128
    x3 = x_ncdhw.reshape(N, C_in, dhw)
    if dhw_pad != dhw:
        # Rare ragged path: pad only up to the next 128-lane boundary.
        x3 = jnp.pad(x3, ((0, 0), (0, 0), (0, dhw_pad - dhw)))
    S_total = dhw_pad // 128
    x4 = x3.reshape(N, C_in, S_total, 128)          # pure reshape when aligned

    # --- choose the sublane tile -------------------------------------------
    s_blk = min(max(tile_m // 128, 8), S_total)
    # v7x megacore: keep >= ~4 total grid steps so both TCs get work
    # (no-op on v5e/v6e other than slightly smaller tiles for small N).
    needed_spatial = pl.cdiv(4, max(N, 1))
    if needed_spatial > 1 and S_total >= needed_spatial * 8:
        s_blk = min(s_blk, max(8, S_total // needed_spatial))
    # (8,128) layout rule: sublane block must be a multiple of 8 unless it is
    # the full array extent.
    if s_blk != S_total:
        s_blk = max(8, (s_blk // 8) * 8)
    num_sp = pl.cdiv(S_total, s_blk)

    # Weights / bias as 32-bit scalars in SMEM.
    w2d = weight.reshape(C_out, C_in).astype(jnp.float32)   # (C_out, C_in)
    b1d = bias.reshape(C_out).astype(jnp.float32)           # (C_out,)

    # Scoped-VMEM guard (only matters if tile_m is pushed very large on v5e).
    itemsize = jnp.dtype(x_ncdhw.dtype).itemsize
    vmem_bytes = 2 * (C_in + C_out) * s_blk * 128 * itemsize   # double-buffered
    cp_kwargs = dict(dimension_semantics=("parallel", "parallel"))
    if vmem_bytes > (12 << 20):
        cp_kwargs["vmem_limit_bytes"] = int(min(vmem_bytes + (8 << 20), 100 << 20))

    out4 = pl.pallas_call(
        _outconv_kernel,
        out_shape=jax.ShapeDtypeStruct((N, C_out, S_total, 128), x_ncdhw.dtype),
        grid_spec=pltpu.PrefetchScalarGridSpec(
            num_scalar_prefetch=0,
            grid=(N, num_sp),
            in_specs=[
                pl.BlockSpec((pl.Squeezed(), C_in, s_blk, 128),
                             lambda n, i: (n, 0, i, 0)),
                pl.BlockSpec(memory_space=pltpu.MemorySpace.SMEM),
                pl.BlockSpec(memory_space=pltpu.MemorySpace.SMEM),
            ],
            out_specs=pl.BlockSpec((pl.Squeezed(), C_out, s_blk, 128),
                                   lambda n, i: (n, 0, i, 0)),
        ),
        compiler_params=pltpu.CompilerParams(**cp_kwargs),
    )(x4, w2d, b1d)

    out3 = out4.reshape(N, C_out, dhw_pad)
    if dhw_pad != dhw:
        out3 = out3[:, :, :dhw]
    return out3.reshape(N, C_out, D, H, W)


def _reference(x, weight, bias):
    C_out, C_in = weight.shape[0], weight.shape[1]
    ref = jnp.einsum("ncdhw,oc->nodhw", x, weight.reshape(C_out, C_in))
    return ref + bias[None, :, None, None, None]


if __name__ == "__main__":
    # Module config (small, consistent with OutConv): in_channels=4, out_channels=3
    in_channels, out_channels = 4, 3
    key = jax.random.PRNGKey(0)
    kx, kw, kb = jax.random.split(key, 3)

    # Deterministic synthetic parameters (shapes per nn.Conv3d(in, out, kernel_size=1))
    weight = jax.random.normal(kw, (out_channels, in_channels, 1, 1, 1),
                               dtype=jnp.float32) * 0.1
    bias = jax.random.normal(kb, (out_channels,), dtype=jnp.float32) * 0.1

    # Case 1: aligned spatial size (D*H*W multiple of 128) -- zero-copy layout path.
    N, D, H, W = 2, 16, 16, 16
    x = jax.random.normal(kx, (N, in_channels, D, H, W), dtype=jnp.float32)
    y = jax.block_until_ready(outconv_pallas(x, weight, bias))
    ref = _reference(x, weight, bias)
    assert y.shape == (N, out_channels, D, H, W)
    assert jnp.allclose(y, ref, atol=1e-5), "mismatch vs reference (aligned)"

    # Case 2: ragged spatial size (exercises the tail-pad path).
    D2, H2, W2 = 5, 6, 7
    x2 = jax.random.normal(kx, (N, in_channels, D2, H2, W2), dtype=jnp.float32)
    y2 = jax.block_until_ready(outconv_pallas(x2, weight, bias))
    ref2 = _reference(x2, weight, bias)
    assert y2.shape == (N, out_channels, D2, H2, W2)
    assert jnp.allclose(y2, ref2, atol=1e-5), "mismatch vs reference (ragged)"

    print("KERNEL_OK")
</pallas_src>

<mosaic_0001>
module attributes {stable_mosaic.version = 11 : i64} {
  func.func @_outconv_kernel(%arg0: i32, %arg1: i32, %arg2: memref<1x4x16x128xf32, #tpu.memory_space<vmem>>, %arg3: memref<3x4xf32, #tpu.memory_space<smem>>, %arg4: memref<3xf32, #tpu.memory_space<smem>>, %arg5: memref<1x3x16x128xf32, #tpu.memory_space<vmem>>) attributes {dimension_semantics = [#tpu.dimension_semantics<parallel>, #tpu.dimension_semantics<parallel>], iteration_bounds = array<i64: 2, 2>, scalar_prefetch = 0 : i64, scratch_operands = 0 : i64, tpu.core_type = #tpu.core_type<tc>, window_params = [{transform_indices = @transform_0, window_bounds = array<i64: 1, 4, 16, 128>}, {transform_indices = @transform_1, window_bounds = array<i64: 3, 4>}, {transform_indices = @transform_2, window_bounds = array<i64: 3>}, {transform_indices = @transform_3, window_bounds = array<i64: 1, 3, 16, 128>}]} {
    %c0 = arith.constant 0 : index
    %c0_0 = arith.constant 0 : index
    %c0_1 = arith.constant 0 : index
    %c0_2 = arith.constant 0 : index
    %0 = vector.load %arg2[%c0, %c0_0, %c0_1, %c0_2] : memref<1x4x16x128xf32, #tpu.memory_space<vmem>>, vector<1x1x16x128xf32>
    %1 = vector.shape_cast %0 : vector<1x1x16x128xf32> to vector<16x128xf32>
    %c0_3 = arith.constant 0 : index
    %c0_4 = arith.constant 0 : index
    %2 = memref.load %arg3[%c0_3, %c0_4] : memref<3x4xf32, #tpu.memory_space<smem>>
    %3 = vector.broadcast %2 : f32 to vector<16x128xf32>
    %4 = arith.mulf %1, %3 : vector<16x128xf32>
    %c0_5 = arith.constant 0 : index
    %c1 = arith.constant 1 : index
    %c0_6 = arith.constant 0 : index
    %c0_7 = arith.constant 0 : index
    %5 = vector.load %arg2[%c0_5, %c1, %c0_6, %c0_7] : memref<1x4x16x128xf32, #tpu.memory_space<vmem>>, vector<1x1x16x128xf32>
    %6 = vector.shape_cast %5 : vector<1x1x16x128xf32> to vector<16x128xf32>
    %c0_8 = arith.constant 0 : index
    %c1_9 = arith.constant 1 : index
    %7 = memref.load %arg3[%c0_8, %c1_9] : memref<3x4xf32, #tpu.memory_space<smem>>
    %8 = vector.broadcast %7 : f32 to vector<16x128xf32>
    %9 = arith.mulf %6, %8 : vector<16x128xf32>
    %10 = arith.addf %4, %9 : vector<16x128xf32>
    %c0_10 = arith.constant 0 : index
    %c2 = arith.constant 2 : index
    %c0_11 = arith.constant 0 : index
    %c0_12 = arith.constant 0 : index
    %11 = vector.load %arg2[%c0_10, %c2, %c0_11, %c0_12] : memref<1x4x16x128xf32, #tpu.memory_space<vmem>>, vector<1x1x16x128xf32>
    %12 = vector.shape_cast %11 : vector<1x1x16x128xf32> to vector<16x128xf32>
    %c0_13 = arith.constant 0 : index
    %c2_14 = arith.constant 2 : index
    %13 = memref.load %arg3[%c0_13, %c2_14] : memref<3x4xf32, #tpu.memory_space<smem>>
    %14 = vector.broadcast %13 : f32 to vector<16x128xf32>
    %15 = arith.mulf %12, %14 : vector<16x128xf32>
    %16 = arith.addf %10, %15 : vector<16x128xf32>
    %c0_15 = arith.constant 0 : index
    %c3 = arith.constant 3 : index
    %c0_16 = arith.constant 0 : index
    %c0_17 = arith.constant 0 : index
    %17 = vector.load %arg2[%c0_15, %c3, %c0_16, %c0_17] : memref<1x4x16x128xf32, #tpu.memory_space<vmem>>, vector<1x1x16x128xf32>
    %18 = vector.shape_cast %17 : vector<1x1x16x128xf32> to vector<16x128xf32>
    %c0_18 = arith.constant 0 : index
    %c3_19 = arith.constant 3 : index
    %19 = memref.load %arg3[%c0_18, %c3_19] : memref<3x4xf32, #tpu.memory_space<smem>>
    %20 = vector.broadcast %19 : f32 to vector<16x128xf32>
    %21 = arith.mulf %18, %20 : vector<16x128xf32>
    %22 = arith.addf %16, %21 : vector<16x128xf32>
    %c0_20 = arith.constant 0 : index
    %23 = memref.load %arg4[%c0_20] : memref<3xf32, #tpu.memory_space<smem>>
    %24 = vector.broadcast %23 : f32 to vector<16x128xf32>
    %25 = arith.addf %22, %24 : vector<16x128xf32>
    %c0_21 = arith.constant 0 : index
    %c0_22 = arith.constant 0 : index
    %c0_23 = arith.constant 0 : index
    %c0_24 = arith.constant 0 : index
    %26 = vector.load %arg5[%c0_21, %c0_22, %c0_23, %c0_24] : memref<1x3x16x128xf32, #tpu.memory_space<vmem>>, vector<1x1x16x128xf32>
    %27 = vector.shape_cast %26 : vector<1x1x16x128xf32> to vector<16x128xf32>
    %28 = vector.shape_cast %25 : vector<16x128xf32> to vector<1x1x16x128xf32>
    tpu.vector_store %arg5[%c0_21, %c0_22, %c0_23, %c0_24], %28 {strides = array<i32>} : memref<1x3x16x128xf32, #tpu.memory_space<vmem>>, vector<1x1x16x128xf32>,
    %c0_25 = arith.constant 0 : index
    %c0_26 = arith.constant 0 : index
    %c0_27 = arith.constant 0 : index
    %c0_28 = arith.constant 0 : index
    %29 = vector.load %arg2[%c0_25, %c0_26, %c0_27, %c0_28] : memref<1x4x16x128xf32, #tpu.memory_space<vmem>>, vector<1x1x16x128xf32>
    %30 = vector.shape_cast %29 : vector<1x1x16x128xf32> to vector<16x128xf32>
    %c1_29 = arith.constant 1 : index
    %c0_30 = arith.constant 0 : index
    %31 = memref.load %arg3[%c1_29, %c0_30] : memref<3x4xf32, #tpu.memory_space<smem>>
    %32 = vector.broadcast %31 : f32 to vector<16x128xf32>
    %33 = arith.mulf %30, %32 : vector<16x128xf32>
    %c0_31 = arith.constant 0 : index
    %c1_32 = arith.constant 1 : index
    %c0_33 = arith.constant 0 : index
    %c0_34 = arith.constant 0 : index
    %34 = vector.load %arg2[%c0_31, %c1_32, %c0_33, %c0_34] : memref<1x4x16x128xf32, #tpu.memory_space<vmem>>, vector<1x1x16x128xf32>
    %35 = vector.shape_cast %34 : vector<1x1x16x128xf32> to vector<16x128xf32>
    %c1_35 = arith.constant 1 : index
    %c1_36 = arith.constant 1 : index
    %36 = memref.load %arg3[%c1_35, %c1_36] : memref<3x4xf32, #tpu.memory_space<smem>>
    %37 = vector.broadcast %36 : f32 to vector<16x128xf32>
    %38 = arith.mulf %35, %37 : vector<16x128xf32>
    %39 = arith.addf %33, %38 : vector<16x128xf32>
    %c0_37 = arith.constant 0 : index
    %c2_38 = arith.constant 2 : index
    %c0_39 = arith.constant 0 : index
    %c0_40 = arith.constant 0 : index
    %40 = vector.load %arg2[%c0_37, %c2_38, %c0_39, %c0_40] : memref<1x4x16x128xf32, #tpu.memory_space<vmem>>, vector<1x1x16x128xf32>
    %41 = vector.shape_cast %40 : vector<1x1x16x128xf32> to vector<16x128xf32>
    %c1_41 = arith.constant 1 : index
    %c2_42 = arith.constant 2 : index
    %42 = memref.load %arg3[%c1_41, %c2_42] : memref<3x4xf32, #tpu.memory_space<smem>>
    %43 = vector.broadcast %42 : f32 to vector<16x128xf32>
    %44 = arith.mulf %41, %43 : vector<16x128xf32>
    %45 = arith.addf %39, %44 : vector<16x128xf32>
    %c0_43 = arith.constant 0 : index
    %c3_44 = arith.constant 3 : index
    %c0_45 = arith.constant 0 : index
    %c0_46 = arith.constant 0 : index
    %46 = vector.load %arg2[%c0_43, %c3_44, %c0_45, %c0_46] : memref<1x4x16x128xf32, #tpu.memory_space<vmem>>, vector<1x1x16x128xf32>
    %47 = vector.shape_cast %46 : vector<1x1x16x128xf32> to vector<16x128xf32>
    %c1_47 = arith.constant 1 : index
    %c3_48 = arith.constant 3 : index
    %48 = memref.load %arg3[%c1_47, %c3_48] : memref<3x4xf32, #tpu.memory_space<smem>>
    %49 = vector.broadcast %48 : f32 to vector<16x128xf32>
    %50 = arith.mulf %47, %49 : vector<16x128xf32>
    %51 = arith.addf %45, %50 : vector<16x128xf32>
    %c1_49 = arith.constant 1 : index
    %52 = memref.load %arg4[%c1_49] : memref<3xf32, #tpu.memory_space<smem>>
    %53 = vector.broadcast %52 : f32 to vector<16x128xf32>
    %54 = arith.addf %51, %53 : vector<16x128xf32>
    %c0_50 = arith.constant 0 : index
    %c1_51 = arith.constant 1 : index
    %c0_52 = arith.constant 0 : index
    %c0_53 = arith.constant 0 : index
    %55 = vector.load %arg5[%c0_50, %c1_51, %c0_52, %c0_53] : memref<1x3x16x128xf32, #tpu.memory_space<vmem>>, vector<1x1x16x128xf32>
    %56 = vector.shape_cast %55 : vector<1x1x16x128xf32> to vector<16x128xf32>
    %57 = vector.shape_cast %54 : vector<16x128xf32> to vector<1x1x16x128xf32>
    tpu.vector_store %arg5[%c0_50, %c1_51, %c0_52, %c0_53], %57 {strides = array<i32>} : memref<1x3x16x128xf32, #tpu.memory_space<vmem>>, vector<1x1x16x128xf32>,
    %c0_54 = arith.constant 0 : index
    %c0_55 = arith.constant 0 : index
    %c0_56 = arith.constant 0 : index
    %c0_57 = arith.constant 0 : index
    %58 = vector.load %arg2[%c0_54, %c0_55, %c0_56, %c0_57] : memref<1x4x16x128xf32, #tpu.memory_space<vmem>>, vector<1x1x16x128xf32>
    %59 = vector.shape_cast %58 : vector<1x1x16x128xf32> to vector<16x128xf32>
    %c2_58 = arith.constant 2 : index
    %c0_59 = arith.constant 0 : index
    %60 = memref.load %arg3[%c2_58, %c0_59] : memref<3x4xf32, #tpu.memory_space<smem>>
    %61 = vector.broadcast %60 : f32 to vector<16x128xf32>
    %62 = arith.mulf %59, %61 : vector<16x128xf32>
    %c0_60 = arith.constant 0 : index
    %c1_61 = arith.constant 1 : index
    %c0_62 = arith.constant 0 : index
    %c0_63 = arith.constant 0 : index
    %63 = vector.load %arg2[%c0_60, %c1_61, %c0_62, %c0_63] : memref<1x4x16x128xf32, #tpu.memory_space<vmem>>, vector<1x1x16x128xf32>
    %64 = vector.shape_cast %63 : vector<1x1x16x128xf32> to vector<16x128xf32>
    %c2_64 = arith.constant 2 : index
    %c1_65 = arith.constant 1 : index
    %65 = memref.load %arg3[%c2_64, %c1_65] : memref<3x4xf32, #tpu.memory_space<smem>>
    %66 = vector.broadcast %65 : f32 to vector<16x128xf32>
    %67 = arith.mulf %64, %66 : vector<16x128xf32>
    %68 = arith.addf %62, %67 : vector<16x128xf32>
    %c0_66 = arith.constant 0 : index
    %c2_67 = arith.constant 2 : index
    %c0_68 = arith.constant 0 : index
    %c0_69 = arith.constant 0 : index
    %69 = vector.load %arg2[%c0_66, %c2_67, %c0_68, %c0_69] : memref<1x4x16x128xf32, #tpu.memory_space<vmem>>, vector<1x1x16x128xf32>
    %70 = vector.shape_cast %69 : vector<1x1x16x128xf32> to vector<16x128xf32>
    %c2_70 = arith.constant 2 : index
    %c2_71 = arith.constant 2 : index
    %71 = memref.load %arg3[%c2_70, %c2_71] : memref<3x4xf32, #tpu.memory_space<smem>>
    %72 = vector.broadcast %71 : f32 to vector<16x128xf32>
    %73 = arith.mulf %70, %72 : vector<16x128xf32>
    %74 = arith.addf %68, %73 : vector<16x128xf32>
    %c0_72 = arith.constant 0 : index
    %c3_73 = arith.constant 3 : index
    %c0_74 = arith.constant 0 : index
    %c0_75 = arith.constant 0 : index
    %75 = vector.load %arg2[%c0_72, %c3_73, %c0_74, %c0_75] : memref<1x4x16x128xf32, #tpu.memory_space<vmem>>, vector<1x1x16x128xf32>
    %76 = vector.shape_cast %75 : vector<1x1x16x128xf32> to vector<16x128xf32>
    %c2_76 = arith.constant 2 : index
    %c3_77 = arith.constant 3 : index
    %77 = memref.load %arg3[%c2_76, %c3_77] : memref<3x4xf32, #tpu.memory_space<smem>>
    %78 = vector.broadcast %77 : f32 to vector<16x128xf32>
    %79 = arith.mulf %76, %78 : vector<16x128xf32>
    %80 = arith.addf %74, %79 : vector<16x128xf32>
    %c2_78 = arith.constant 2 : index
    %81 = memref.load %arg4[%c2_78] : memref<3xf32, #tpu.memory_space<smem>>
    %82 = vector.broadcast %81 : f32 to vector<16x128xf32>
    %83 = arith.addf %80, %82 : vector<16x128xf32>
    %c0_79 = arith.constant 0 : index
    %c2_80 = arith.constant 2 : index
    %c0_81 = arith.constant 0 : index
    %c0_82 = arith.constant 0 : index
    %84 = vector.load %arg5[%c0_79, %c2_80, %c0_81, %c0_82] : memref<1x3x16x128xf32, #tpu.memory_space<vmem>>, vector<1x1x16x128xf32>
    %85 = vector.shape_cast %84 : vector<1x1x16x128xf32> to vector<16x128xf32>
    %86 = vector.shape_cast %83 : vector<16x128xf32> to vector<1x1x16x128xf32>
    tpu.vector_store %arg5[%c0_79, %c2_80, %c0_81, %c0_82], %86 {strides = array<i32>} : memref<1x3x16x128xf32, #tpu.memory_space<vmem>>, vector<1x1x16x128xf32>,
    return
  }
  func.func @transform_0(%arg0: i32, %arg1: i32) -> (i32, i32, i32, i32) {
    %c0_i32 = arith.constant 0 : i32
    %c0_i32_0 = arith.constant 0 : i32
    %c0_i32_1 = arith.constant 0 : i32
    return %arg0, %c0_i32, %arg1, %c0_i32_0 : i32, i32, i32, i32
  }
  func.func @transform_1(%arg0: i32, %arg1: i32) -> (i32, i32) {
    %c0_i32 = arith.constant 0 : i32
    %c0_i32_0 = arith.constant 0 : i32
    %c0_i32_1 = arith.constant 0 : i32
    return %c0_i32, %c0_i32_0 : i32, i32
  }
  func.func @transform_2(%arg0: i32, %arg1: i32) -> i32 {
    %c0_i32 = arith.constant 0 : i32
    %c0_i32_0 = arith.constant 0 : i32
    return %c0_i32 : i32
  }
  func.func @transform_3(%arg0: i32, %arg1: i32) -> (i32, i32, i32, i32) {
    %c0_i32 = arith.constant 0 : i32
    %c0_i32_0 = arith.constant 0 : i32
    %c0_i32_1 = arith.constant 0 : i32
    return %arg0, %c0_i32, %arg1, %c0_i32_0 : i32, i32, i32, i32
  }
}

</mosaic_0001>

<bundles_post_ra>
// kernel: tpu_custom_call.1
= control target key start
LH: loop header
LB: loop body
LE: loop exit
PB: predicated region body
PF: predicated region fallthrough
CT: control target
= control target key end

     0   :  { %s1111_s0 = inlined_call_operand.hbm [shape: f32[2,4,32,128], index: 0, kind: input, shape index: {}]   ;;  %s1112_s1 = inlined_call_operand.hbm [shape: f32[3,4], index: 1, kind: input, shape index: {}]   ;;  %s1113_s2 = inlined_call_operand.vmem [shape: f32[3], index: 2, kind: input, shape index: {}]   ;;  %s1114_s3 = inlined_call_operand.hbm [shape: f32[2,3,32,128], index: 3, kind: output, shape index: {}]  }
   0x1   :  { %1118 = sst [smem:[#allocation22_spill]] %s1112_s1 }
   0x2   :  { %1119 = sst [smem:[#allocation23_spill]] %s1113_s2 }
   0x3   :  { %8 = vsyncpa [#allocation3], 0 }
   0x4   :  { %10 = vsyncpa [#allocation3 + $0x1], 0 }
   0x5   :  { %11 = vsyncpa [#allocation5], 0 }
   0x6   :  { %12 = vsyncpa [#allocation6], 0 }
   0x7   :  { %13 = vsyncpa [#allocation4], 0 }
   0x8   :  { %15 = vsyncpa [#allocation4 + $0x1], 0  ;;  %s853_s12 = smov 0   ;;  %s855_s13 = smov 0  }
   0x9   :  { %s857_s14 = smov 0   ;;  %s859_s15 = smov 0  }
   0xa   :  { %s861_s16 = smov 0   ;;  %s863_s17 = smov 0  }
   0xb   :  { %s865_s18 = smov 0   ;;  %s867_s19 = smov 0  }
   0xc LB: > { %1120 = sst [smem:[#allocation19_spill]] %s812_s18  ;;  %s531_s20 = sadd.s32 4294967295, %s816_s19   ;;  %s816_s19 = sphi %s867_s19, %s21_s19   ;;  %s812_s18 = sphi %s865_s18, %s1133_s18   ;;  %s808_s17 = sphi %s863_s17, %s1138_s17   ;;  %s804_s16 = sphi %s861_s16, %s1131_s16   ;;  %s800_s15 = sphi %s859_s15, %s1137_s15   ;;  %s796_s14 = sphi %s857_s14, %s1136_s14   ;;  %s792_s13 = sphi %s855_s13, %s1135_s13   ;;  %s788_s12 = sphi %s853_s12, %s1134_s12  }
   0xd   : > { %s532_s21 = sadd.s32 4294967294, %s816_s19   ;;  %s30_s22 = sadd.s32 1, %s808_s17 }
   0xe   : > { %s33_s23 = sadd.s32 1, %s812_s18  ;;  %p31_p0 = scmp.ge.s32.totalorder %s30_s22, 2 }
   0xf   : > { %s42_s24 = sadd.s32 1, %s796_s14  ;;  %p49_p1 = scmp.ne.s32.totalorder %s796_s14, %s792_s13 }
  0x10   : > { %p50_p2 = scmp.eq.s32.totalorder %s816_s19, 0  ;;  %s1140_s22 = smov (%p31_p0, %s30_s22), 0 }
  0x11   : > { %1121 = sst [smem:[#allocation20_spill]] %s1140_s22  ;;  %s1142_s23 = smov (!%p31_p0, %s33_s23), %s812_s18 }
  0x12   : > { %s38_s25 = ssub.s32 %s808_s17, %s1140_s22  ;;  %p906_p3 = por %p50_p2, %p49_p1 }
  0x13   : > { %p35_p4 = scmp.ge.s32.totalorder %s1142_s23, 2  ;;  %p55_p5 = scmp.ne.s32.totalorder %s792_s13, %s788_s12 }
  0x14   : > { %p912_p6 = scmp.eq.s32.totalorder %s531_s20, 0  ;;  %p123_p7 = scmp.eq.s32.totalorder %s531_s20, 3 }
  0x15   : > { %s1144_s23 = smov (%p35_p4, %s1142_s23), 0  ;;  %p129_p10 = scmp.eq.s32.totalorder %s532_s21, 3 }
  0x16   : > { %1124 = sst [smem:[#allocation21_spill]] %s1144_s23  ;;  %p920_p8 = por %p912_p6, %p55_p5 }
  0x17   : > { %p924_p9 = por %p123_p7, %p49_p1  ;;  %s37_s30 = ssub.s32 %s812_s18, %s1144_s23 }
  0x18   : > { %s39_s4 = sor.u32 %s38_s25, %s37_s30  ;;  %p533_p11 = scmp.ge.s32.totalorder %s816_s19, 1 }
  0x19   : > { %p40_p12 = scmp.eq.s32.totalorder %s39_s4, 0  ;;  %p931_p13 = por %p129_p10, %p55_p5 }
  0x1a   : > { %p136_p0 = scmp.lt.s32.totalorder %s816_s19, 5  ;;  %s1129_s1 = sld [smem:[#allocation22_spill]] }
  0x1b   : > { %s937_s6 = scalar_select %p40_p12, %s796_s14, %s42_s24  }
  0x1c   : > { %p939_p2 = pnand %p533_p11, %p136_p0  ;;  %s1130_s2 = sld [smem:[#allocation23_spill]] }
  0x1d   : > { %s818_s24 = smov [#allocation7]   ;;  %s819_s25 = smov [#allocation8]  }
  0x1e   : > { %p613_p1 = pneg %p939_p2  ;;  %p536_p5 = scmp.ge.s32.totalorder %s816_s19, 4 }
  0x20   : > { %s148_s10 = sshll.u32 %s1129_s1, 4  ;;  %p614_p4 = pnand %p613_p1, %p912_p6  ;;  %s149_s10 = int_to_ptr.hbm [resolvable:$true] %s148_s10 }
  0x21   : > { %165 = sbr.rel (%p536_p5) target bundleno = 54 (0x36), region = 24 }
  0x22   : > { %s158_s21 = sshll.u32 %s1130_s2, 4  ;;  %s159_s21 = int_to_ptr.vmem [resolvable:$true] %s158_s21 }
  0x23   : > { %616 = dma.hbm_to_smem (!%p614_p4), %s149_s10, 64, %s818_s24, [#allocation5]  }
  0x24   : > { %619 = dma.vmem_to_smem (!%p614_p4), %s159_s21, 16, %s819_s25, [#allocation6]  }
  0x26   : > { %s169_s30 = sand.u32 1, %s796_s14   ;;  %s538_s4 = sshll.u32 %s808_s17, 1 }
  0x27   : > { %s537_s8 = sshll.u32 %s169_s30, 6  ;;  %s539_s9 = sshll.u32 %s812_s18, 4 }
  0x28   : > { %s178_s11 = sadd.s32 %s539_s9, %s538_s4  ;;  %s173_s10 = scalar_lea.vmem [#allocation2], %s537_s8 }
  0x29   : > { %s540_s20 = sshll.u32 %s178_s11, 3  ;;  %s195_s21 = sshll.u32 %s173_s10, 4  ;;  %s196_s21 = int_to_ptr.vmem [resolvable:$true] %s195_s21 }
  0x2a   : > { %s180_s1 = scalar_lea.hbm %s1111_s0, %s540_s20  ;;  %s820_s23 = smov 512  }
  0x2b   : > { %s592_s2 = scalar_select %p906_p3, [#allocation0], [#allocation14] }
  0x2c   : > { %593 = sst [smem:[#allocation11]] (%p906_p3), %s820_s23  ;;  %s193_s18 = sshll.u32 %s180_s1, 4  ;;  %s194_s18 = int_to_ptr.hbm [resolvable:$true] %s193_s18 }
  0x2d   : > { %s185_s22 = sld [smem:[%s592_s2]]   ;;  %s821_s4 = smov 256  }
  0x2e   : > { %594 = sst [smem:[#allocation11 + $0x1]] (%p906_p3), %s821_s4  ;;  %s822_s8 = smov 2  }
  0x2f   : > { %595 = sst [smem:[#allocation11 + $0x2]] (%p906_p3), %s822_s8  ;;  %s823_s9 = smov 128  }
  0x30   : > { %596 = sst [smem:[#allocation11 + $0x3]] (%p906_p3), %s823_s9  ;;  %s824_s20 = smov 8  }
  0x31   : > { %597 = sst [smem:[#allocation11 + $0x4]] (%p906_p3), %s823_s9  ;;  %s170_s2 = scalar_lea.sflag [#allocation3], %s169_s30 }
  0x32   : > { %598 = sst [smem:[#allocation11 + $0x5]] (%p906_p3), %s824_s20  ;;  %s825_s10 = smov [#allocation10]  }
  0x33   : > { %s541_s11 = sshll.u32 %s185_s22, 26 }
  0x34   : > { %s542_s23 = sadd.s32 134217728, %s541_s11 }
  0x35   : > { %599 = dma.general (%p906_p3), %s194_s18, 1024, %s196_s21, %s170_s2, %s825_s10, [#allocation11], %s542_s23, 0  }
  0x36 PF: > { %220 = sbr.rel (%p939_p2) target bundleno = 108 (0x6c), region = 32  ;;  %s979_s1 = sand.u32 (!%p939_p2), 1, %s792_s13  }
  0x37   : > { %s544_s24 = sshll.u32 (!%p939_p2), %s979_s1, 6  ;;  %s223_s22 = scalar_lea.sflag (!%p939_p2), [#allocation3], %s979_s1 }
  0x38   : > { %s226_s25 = scalar_lea.vmem (!%p939_p2), [#allocation2], %s544_s24 }
  0x3b   : > { %771 = dma.done.wait (%p920_p8), %s223_s22, 1024  }
  0x3c   : > { %773 = vsyncadd (%p920_p8), %s223_s22, 4294966272 }
  0x3d   : > { %775 = dma.done.wait (%p912_p6), [#allocation5], 64  }
  0x3e   : > { %777 = vsyncadd (%p912_p6), [#allocation5], 4294967232 }
  0x3f   : > { %779 = dma.done.wait (%p912_p6), [#allocation6], 16  }
  0x40   : > { %781 = vsyncadd (%p912_p6), [#allocation6], 4294967280 }
  0x41   : > { %242 = sfence }
  0x42   : > { %s265_s18 = sld [smem:[#allocation7]]  ;;  %v263_v0 = vld [vmem:[%s226_s25] sm:$0xff]  ;;  %v999_v1 = vld [vmem:[%s226_s25 + $0x8] sm:$0xff]  ;;  %v547_v2 = vld [vmem:[%s226_s25 + $0x10] sm:$0xff]  ;;  %s586_s20 = smul.u32 48, %s979_s1 }
  0x43   : > { %s549_s26 = sld [smem:[#allocation7 + $0x1]]  ;;  %v1001_v3 = vld [vmem:[%s226_s25 + $0x18] sm:$0xff]  ;;  %v550_v5 = vld [vmem:[%s226_s25 + $0x20] sm:$0xff]  ;;  %v1005_v6 = vld [vmem:[%s226_s25 + $0x28] sm:$0xff] }
  0x44   : > { %s552_s7 = sld [smem:[#allocation7 + $0x2]]  ;;  %v553_v9 = vld [vmem:[%s226_s25 + $0x30] sm:$0xff]  ;;  %v1013_v14 = vld [vmem:[%s226_s25 + $0x38] sm:$0xff]  ;;  %s1047_s22 = scalar_lea.vmem [#allocation9], %s586_s20 }
  0x45   : > { %s995_s30 = sld [smem:[#allocation7 + $0x3]]  ;;  %s377_s25 = scalar_lea.sflag [#allocation4], %s979_s1 }
  0x46   : > { %s997_s28 = sld [smem:[#allocation8]] }
  0x47   : > { %s1003_s21 = sld [smem:[#allocation7 + $0x80]] }
  0x48   : > { %v266_v4 = vstv %s265_s18  ;;  %s1007_s27 = sld [smem:[#allocation7 + $0x81]] }
  0x49   : > { %v267_v7 = vmul.f32 %v266_v4, %v263_v0  ;;  %v273_v8 = vstv %s549_s26  ;;  %v268_v10 = vmul.f32 %v266_v4, %v999_v1  ;;  %s1010_s4 = sld [smem:[#allocation7 + $0x82]] }
  0x4a   : > { %v274_v11 = vmul.f32 %v547_v2, %v273_v8  ;;  %v282_v12 = vstv %s552_s7  ;;  %v275_v13 = vmul.f32 %v1001_v3, %v273_v8  ;;  %s1015_s8 = sld [smem:[#allocation7 + $0x83]] }
  0x4b   : > { %v283_v15 = vmul.f32 %v550_v5, %v282_v12  ;;  %v291_v16 = vstv %s995_s30  ;;  %v284_v17 = vmul.f32 %v1005_v6, %v282_v12  ;;  %s1019_s9 = sld [smem:[#allocation8 + $0x1]] }
  0x4c   : > { %v276_v18 = vadd.f32 %v274_v11, %v267_v7  ;;  %v292_v19 = vmul.f32 %v553_v9, %v291_v16  ;;  %v277_v20 = vadd.f32 %v275_v13, %v268_v10  ;;  %s1021_s11 = sld [smem:[#allocation7 + $0x100]]  ;;  %v297_v21 = vstv %s997_s28 }
  0x4d   : > { %v293_v22 = vmul.f32 %v1013_v14, %v291_v16  ;;  %v305_v23 = vstv %s1003_s21  ;;  %s1027_s23 = sld [smem:[#allocation7 + $0x101]] }
  0x4e   : > { %v285_v24 = vadd.f32 %v283_v15, %v276_v18  ;;  %v286_v25 = vadd.f32 %v284_v17, %v277_v20  ;;  %v306_v26 = vmul.f32 %v305_v23, %v263_v0  ;;  %v311_v27 = vstv %s1007_s27  ;;  %s1030_s2 = sld [smem:[#allocation7 + $0x102]] }
  0x4f   : > { %v312_v28 = vmul.f32 %v547_v2, %v311_v27  ;;  %v319_v29 = vstv %s1010_s4  ;;  %v307_v30 = vmul.f32 %v305_v23, %v999_v1  ;;  %v313_v31 = vmul.f32 %v1001_v3, %v311_v27  ;;  %s1035_s10 = sld [smem:[#allocation7 + $0x103]] }
  0x50   : > { %v294_v32 = vadd.f32 %v292_v19, %v285_v24  ;;  %v295_v33 = vadd.f32 %v293_v22, %v286_v25  ;;  %v320_v34 = vmul.f32 %v550_v5, %v319_v29  ;;  %v327_v35 = vstv %s1015_s8  ;;  %s1038_s24 = sld [smem:[#allocation8 + $0x2]] }
  0x51   : > { %v314_v36 = vadd.f32 %v312_v28, %v306_v26  ;;  %v328_v37 = vmul.f32 %v553_v9, %v327_v35  ;;  %v315_v38 = vadd.f32 %v313_v31, %v307_v30  ;;  %v321_v41 = vmul.f32 %v1005_v6, %v319_v29 }
  0x52   : > { %v298_v39 = vadd.f32 %v297_v21, %v294_v32  ;;  %v299_v40 = vadd.f32 %v297_v21, %v295_v33  ;;  %v329_v42 = vmul.f32 %v1013_v14, %v327_v35  ;;  %v333_v44 = vstv %s1019_s9 }
  0x53   : > { %v322_v43 = vadd.f32 %v320_v34, %v314_v36  ;;  %v342_v45 = vstv %s1021_s11  ;;  %v348_v46 = vstv %s1027_s23  ;;  %v323_v47 = vadd.f32 %v321_v41, %v315_v38 }
  0x54   : > { %300 = vst [vmem:[%s1047_s22] sm:$0xff] %v298_v39  ;;  %v343_v48 = vmul.f32 %v342_v45, %v263_v0  ;;  %v349_v49 = vmul.f32 %v547_v2, %v348_v46  ;;  %v356_v50 = vstv %s1030_s2  ;;  %v344_v54 = vmul.f32 %v342_v45, %v999_v1 }
  0x55   : > { %301 = vst [vmem:[%s1047_s22 + $0x8] sm:$0xff] %v299_v40  ;;  %v330_v51 = vadd.f32 %v328_v37, %v322_v43  ;;  %v357_v52 = vmul.f32 %v550_v5, %v356_v50  ;;  %v364_v53 = vstv %s1035_s10  ;;  %v331_v55 = vadd.f32 %v329_v42, %v323_v47 }
  0x56   : > { %v351_v56 = vadd.f32 %v349_v49, %v343_v48  ;;  %v365_v57 = vmul.f32 %v553_v9, %v364_v53  ;;  %v350_v59 = vmul.f32 %v1001_v3, %v348_v46  ;;  %v358_v60 = vmul.f32 %v1005_v6, %v356_v50 }
  0x57   : > { %v334_v58 = vadd.f32 %v333_v44, %v330_v51  ;;  %v335_v61 = vadd.f32 %v333_v44, %v331_v55  ;;  %v370_v63 = vstv %s1038_s24  ;;  %v366_v2 = vmul.f32 %v1013_v14, %v364_v53 }
  0x58   : > { %v359_v62 = vadd.f32 %v357_v52, %v351_v56  ;;  %v352_v0 = vadd.f32 %v350_v59, %v344_v54 }
  0x59   : > { %567 = vst [vmem:[%s1047_s22 + $0x10] sm:$0xff] %v334_v58 }
  0x5a   : > { %568 = vst [vmem:[%s1047_s22 + $0x18] sm:$0xff] %v335_v61  ;;  %v367_v1 = vadd.f32 %v365_v57, %v359_v62  ;;  %v360_v4 = vadd.f32 %v358_v60, %v352_v0 }
  0x5c   : > { %v371_v5 = vadd.f32 %v370_v63, %v367_v1  ;;  %v368_v7 = vadd.f32 %v366_v2, %v360_v4 }
  0x5e   : > { %580 = vst [vmem:[%s1047_s22 + $0x20] sm:$0xff] %v371_v5  ;;  %v372_v8 = vadd.f32 %v370_v63, %v368_v7 }
  0x60   : > { %581 = vst [vmem:[%s1047_s22 + $0x28] sm:$0xff] %v372_v8 }
  0x61   : > { %s582_s18 = sshll.u32 %s800_s15, 1  ;;  %s587_s26 = smul.u32 12, %s804_s16 }
  0x62   : > { %s401_s7 = sshll.u32 %s1047_s22, 4  ;;  %s826_s21 = smov 256   ;;  %s402_s7 = int_to_ptr.vmem [resolvable:$true] %s401_s7 }
  0x63   : > { %s388_s30 = sadd.s32 %s587_s26, %s582_s18  ;;  %605 = sst [smem:[#allocation13]] (%p924_p9), %s826_s21 }
  0x64   : > { %s583_s28 = sshll.u32 %s388_s30, 3  ;;  %s827_s9 = smov 512  }
  0x65   : > { %s390_s4 = scalar_lea.hbm %s1114_s3, %s583_s28  ;;  %606 = sst [smem:[#allocation13 + $0x1]] (%p924_p9), %s827_s9 }
  0x66   : > { %s403_s8 = sshll.u32 %s390_s4, 4  ;;  %s828_s15 = smov 2   ;;  %s404_s8 = int_to_ptr.hbm [resolvable:$true] %s403_s8 }
  0x67   : > { %607 = sst [smem:[#allocation13 + $0x2]] (%p924_p9), %s828_s15  ;;  %s829_s16 = smov 128  }
  0x68   : > { %608 = sst [smem:[#allocation13 + $0x3]] (%p924_p9), %s829_s16  ;;  %s830_s11 = smov 8  }
  0x69   : > { %609 = sst [smem:[#allocation13 + $0x4]] (%p924_p9), %s829_s16  ;;  %s831_s20 = smov [#allocation12]  }
  0x6a   : > { %610 = sst [smem:[#allocation13 + $0x5]] (%p924_p9), %s830_s11  ;;  %s832_s23 = smov 0  }
  0x6b   : > { %611 = dma.general (%p924_p9), %s402_s7, 768, %s404_s8, %s377_s25, %s831_s20, [#allocation13], %s832_s23, 0  }
  0x6c PF: > { %p628_p3 = scmp.ge.s32.totalorder %s816_s19, 2  ;;  %s431_s2 = sand.u32 1, %s788_s12  }
  0x6d   : > { %s432_s10 = scalar_lea.sflag [#allocation4], %s431_s2 }
  0x6e   : > { %p621_p6 = pnand %p628_p3, %p931_p13 }
  0x70   : > { %p622_p7 = pneg %p621_p6 }
  0x72   : > { %783 = dma.done.wait (%p622_p7), %s432_s10, 768  }
  0x73   : > { %785 = vsyncadd (%p622_p7), %s432_s10, 4294966528  ;;  %s21_s19 = sadd.s32 1, %s816_s19   ;;  %s1131_s16 = sld [smem:[#allocation19_spill]] }
  0x74   : > { %p18_p8 = scmp.ge.s32.totalorder %s21_s19, 6   ;;  %s1132_s29 = sld [smem:[#allocation20_spill]] }
  0x75   : > { %s1133_s18 = sld [smem:[#allocation21_spill]]  ;;  %s1134_s12 = smov %s792_s13 }
  0x76   : > { %s1135_s13 = smov %s796_s14  ;;  %s1136_s14 = smov %s937_s6 }
  0x77   : > { %s1137_s15 = smov %s808_s17  ;;  %20 = sbr.rel (!%p18_p8) target bundleno = 12 (0xc), region = 102 }
  0x7a   : > { %s1138_s17 = smov %s1132_s29 }
  0x7c   :  { %438 = vsyncpa [#allocation3], 1 }
  0x7d   :  { %440 = vsyncpa [#allocation3 + $0x1], 1 }
  0x7e   :  { %441 = vsyncpa [#allocation4], 1 }
  0x7f   :  { %443 = vsyncpa [#allocation4 + $0x1], 1 }
  0x80   :  { %444 = vsyncpa [#allocation5], 1 }
  0x81   :  { %446 = vsyncpa [#allocation5 + $0x1], 1 }
  0x82   :  { %447 = vsyncpa [#allocation6], 1 }
  0x83   :  { %449 = vsyncpa [#allocation6 + $0x1], 1 }

</bundles_post_ra>
